<compile_context>
chip_gen: v5e
topology: v5e:2x2
jax: 0.10.0
libtpu: 0.0.40
codegen_flags: <defaults>
</compile_context>

<pallas_src>
import math

import numpy as np
import jax
import jax.numpy as jnp
from jax import lax
from jax.experimental import pallas as pl
from jax.experimental.pallas import tpu as pltpu

# ---------------- model dims (small, consistent with the module) ----------------
B = 2          # batch
S = 8          # sequence length
D = 32         # d_model
H = 4          # nhead
HD = D // H    # head dim
FF = 4 * D     # feed-forward hidden
BS = B * S     # flattened rows
LN_EPS = 1e-5

# rows of the packed (8, 128) bias/LayerNorm slab
_ROW_IN_B, _ROW_OUT_B, _ROW_LN1G, _ROW_LN1B = 0, 1, 2, 3
_ROW_B1, _ROW_B2, _ROW_LN2G, _ROW_LN2B = 4, 5, 6, 7
_SLAB_COLS = 128   # >= max(3*D, FF) and exactly one lane tile


def _layernorm(x, gamma, beta):
    mu = jnp.mean(x, axis=-1, keepdims=True)
    var = jnp.mean((x - mu) ** 2, axis=-1, keepdims=True)
    return (x - mu) * lax.rsqrt(var + LN_EPS) * gamma + beta


def _gelu_exact(x):
    # nn.GELU() default (approximate='none'): 0.5*x*(1+erf(x/sqrt(2)))
    return 0.5 * x * (1.0 + lax.erf(x * 0.7071067811865476))


def encoder_layer_kernel(
    x_ref,       # (BS, D)   f32
    in_w_ref,    # (D, 3D)   bf16 == in_proj_weight.T, Q columns pre-scaled by 1/sqrt(HD)
    out_w_ref,   # (D, D)    bf16 == out_proj.weight.T
    w1_ref,      # (D, 4D)   bf16 == linear1.weight.T
    w2_ref,      # (4D, D)   bf16 == linear2.weight.T
    bias_ref,    # (8, 128)  f32 packed bias / LayerNorm slab
    mask_ref,    # (BS, BS)  f32 block-diagonal additive mask (0 / -1e30)
    o_ref,       # (BS, D)
):
    x = x_ref[...].astype(jnp.float32)                 # (BS, D), f32 for VPU math
    x_bf = x.astype(jnp.bfloat16)                      # MXU operand

    # ---- unpack the bias slab with static sublane/lane slices ----
    in_b = bias_ref[_ROW_IN_B, :3 * D]
    out_b = bias_ref[_ROW_OUT_B, :D]
    ln1_g = bias_ref[_ROW_LN1G, :D]
    ln1_b = bias_ref[_ROW_LN1B, :D]
    b1 = bias_ref[_ROW_B1, :FF]
    b2 = bias_ref[_ROW_B2, :D]
    ln2_g = bias_ref[_ROW_LN2G, :D]
    ln2_b = bias_ref[_ROW_LN2B, :D]

    # ---- QKV projection: one (BS,D)x(D,3D) bf16 matmul for the whole batch ----
    qkv = jnp.dot(x_bf, in_w_ref[...], preferred_element_type=jnp.float32) + in_b
    q = qkv[:, 0 * D:1 * D].astype(jnp.bfloat16)       # q-scale folded into weights
    k = qkv[:, 1 * D:2 * D].astype(jnp.bfloat16)
    v = qkv[:, 2 * D:3 * D].astype(jnp.bfloat16)

    neg_bias = mask_ref[...]                            # precomputed constant mask

    # ---- per-head attention (static loop); no explicit K transpose ----
    head_outs = []
    for h in range(H):
        lo = h * HD
        qh = q[:, lo:lo + HD]                           # (BS, HD) bf16
        kh = k[:, lo:lo + HD]                           # (BS, HD) bf16
        vh = v[:, lo:lo + HD]                           # (BS, HD) bf16
        # contract K on its last dim (rhs-transposed contraction on the MXU)
        s = lax.dot_general(qh, kh, (((1,), (1,)), ((), ())),
                            preferred_element_type=jnp.float32) + neg_bias
        s = s - jnp.max(s, axis=-1, keepdims=True)
        p = jnp.exp(s)
        p = p * pl.reciprocal(jnp.sum(p, axis=-1, keepdims=True), approx=True)
        head_outs.append(jnp.dot(p.astype(jnp.bfloat16), vh,
                                 preferred_element_type=jnp.float32))  # (BS, HD)

    # ---- heads concatenated along lanes; single fused K=32 output projection ----
    attn_heads = jnp.concatenate(head_outs, axis=-1)    # (BS, D) f32
    attn = jnp.dot(attn_heads.astype(jnp.bfloat16), out_w_ref[...],
                   preferred_element_type=jnp.float32) + out_b

    # ---- residual + norm1, feed-forward + residual + norm2 (all f32) ----
    h1 = _layernorm(x + attn, ln1_g, ln1_b)             # (BS, D)
    ff = jnp.dot(h1.astype(jnp.bfloat16), w1_ref[...],
                 preferred_element_type=jnp.float32) + b1
    ff = _gelu_exact(ff)
    ff2 = jnp.dot(ff.astype(jnp.bfloat16), w2_ref[...],
                  preferred_element_type=jnp.float32) + b2
    out = _layernorm(h1 + ff2, ln2_g, ln2_b)

    o_ref[...] = out.astype(o_ref.dtype)


# ---------------- parameter preparation (host side) ----------------
def _prepare_params(params):
    """Fold q-scale into in_proj, cast matmul weights to bf16, pack small vectors."""
    scale = 1.0 / math.sqrt(HD)
    in_w = params["in_w"].at[:, :D].multiply(scale)
    in_b = params["in_b"].at[:, :D].multiply(scale)

    def row(vec):
        vec = jnp.asarray(vec, jnp.float32).reshape(-1)
        return jnp.pad(vec, (0, _SLAB_COLS - vec.shape[0]))

    bias_slab = jnp.stack(
        [row(in_b), row(params["out_b"]), row(params["ln1_g"]), row(params["ln1_b"]),
         row(params["b1"]), row(params["b2"]), row(params["ln2_g"]), row(params["ln2_b"])],
        axis=0)                                          # (8, 128) f32

    return dict(
        in_w=in_w.astype(jnp.bfloat16),
        out_w=params["out_w"].astype(jnp.bfloat16),
        w1=params["w1"].astype(jnp.bfloat16),
        w2=params["w2"].astype(jnp.bfloat16),
        bias_slab=bias_slab,
    )


def _block_diag_mask():
    # trace-time numpy constant: 0 inside each batch's own block, -1e30 elsewhere
    row = np.arange(BS) // S
    return jnp.asarray(np.where(row[:, None] == row[None, :], 0.0, -1e30),
                       dtype=np.float32)


_VMEM_SPEC = pl.BlockSpec(memory_space=pltpu.MemorySpace.VMEM)


def transformer_encoder_layer(x, params):
    """x: (B, S, D) float32. params: module params with pre-transposed weights."""
    w = _prepare_params(params)
    mask = _block_diag_mask()
    x2 = x.reshape(BS, D)

    # Grid-less call: everything resident in VMEM, no pipeline / double-buffering.
    # TODO(synk): at larger B*S split rows into a "parallel" grid axis (v7x: 2 TCs)
    # and tile the FFN over FF once weights no longer fit comfortably in VMEM.
    out = pl.pallas_call(
        encoder_layer_kernel,
        out_shape=jax.ShapeDtypeStruct((BS, D), x.dtype),
        in_specs=[_VMEM_SPEC] * 7,
        out_specs=_VMEM_SPEC,
    )(x2, w["in_w"], w["out_w"], w["w1"], w["w2"], w["bias_slab"], mask)
    return out.reshape(B, S, D)


# ---------------- plain-JAX reference (f32, PyTorch forward semantics) ----------------
def reference_layer(x, p):
    qkv = x @ p["in_w"] + p["in_b"][0]
    q, k, v = qkv[..., :D], qkv[..., D:2 * D], qkv[..., 2 * D:]
    q = q * (1.0 / math.sqrt(HD))

    def split_heads(t):  # (B,S,D) -> (B,H,S,HD)
        return t.reshape(B, S, H, HD).transpose(0, 2, 1, 3)

    qh, kh, vh = split_heads(q), split_heads(k), split_heads(v)
    scores = jnp.einsum("bhqd,bhkd->bhqk", qh, kh)
    probs = jax.nn.softmax(scores, axis=-1)
    attn = jnp.einsum("bhqk,bhkd->bhqd", probs, vh)
    attn = attn.transpose(0, 2, 1, 3).reshape(B, S, D)
    attn = attn @ p["out_w"] + p["out_b"][0]

    h1 = _layernorm(x + attn, p["ln1_g"][0], p["ln1_b"][0])
    ff = h1 @ p["w1"] + p["b1"][0]
    ff = _gelu_exact(ff)
    ff = ff @ p["w2"] + p["b2"][0]
    return _layernorm(h1 + ff, p["ln2_g"][0], p["ln2_b"][0])


def init_params(key):
    ks = jax.random.split(key, 8)
    scale = 0.02
    # Stored pre-transposed so the kernel does x @ W directly.
    return {
        "in_w": jax.random.normal(ks[0], (D, 3 * D), jnp.float32) * scale,   # in_proj_weight.T
        "in_b": jax.random.normal(ks[1], (1, 3 * D), jnp.float32) * scale,
        "out_w": jax.random.normal(ks[2], (D, D), jnp.float32) * scale,       # out_proj.weight.T
        "out_b": jax.random.normal(ks[3], (1, D), jnp.float32) * scale,
        "ln1_g": jnp.ones((1, D), jnp.float32),
        "ln1_b": jnp.zeros((1, D), jnp.float32),
        "w1": jax.random.normal(ks[4], (D, FF), jnp.float32) * scale,         # linear1.weight.T
        "b1": jax.random.normal(ks[5], (1, FF), jnp.float32) * scale,
        "w2": jax.random.normal(ks[6], (FF, D), jnp.float32) * scale,         # linear2.weight.T
        "b2": jax.random.normal(ks[7], (1, D), jnp.float32) * scale,
        "ln2_g": jnp.ones((1, D), jnp.float32),
        "ln2_b": jnp.zeros((1, D), jnp.float32),
    }


if __name__ == "__main__":
    key = jax.random.PRNGKey(0)
    kx, kp = jax.random.split(key)
    x = jax.random.normal(kx, (B, S, D), jnp.float32)
    params = init_params(kp)

    out = transformer_encoder_layer(x, params)
    out = jax.block_until_ready(out)

    ref = reference_layer(x, params)
    assert out.shape == (B, S, D)
    err = jnp.max(jnp.abs(out - ref))
    # bf16 MXU inputs (and approx softmax reciprocal) vs the f32 reference:
    # expected drift ~1e-3; 1e-2 tolerance keeps a wide safety margin.
    assert jnp.allclose(out, ref, rtol=1e-2, atol=1e-2), f"max abs err {err}"

    # TODO(synk): attn_weights (need_weights=True) are computed by the module but
    # not returned in its default forward path; not materialized as a kernel output.
    print("KERNEL_OK")
</pallas_src>

<mosaic_0001>
module attributes {stable_mosaic.version = 11 : i64} {
  func.func @encoder_layer_kernel(%arg0: memref<16x32xf32, #tpu.memory_space<vmem>>, %arg1: memref<32x96xbf16, #tpu.memory_space<vmem>>, %arg2: memref<32x32xbf16, #tpu.memory_space<vmem>>, %arg3: memref<32x128xbf16, #tpu.memory_space<vmem>>, %arg4: memref<128x32xbf16, #tpu.memory_space<vmem>>, %arg5: memref<8x128xf32, #tpu.memory_space<vmem>>, %arg6: memref<16x16xf32, #tpu.memory_space<vmem>>, %arg7: memref<16x32xf32, #tpu.memory_space<vmem>>) attributes {dimension_semantics = [], scalar_prefetch = 0 : i64, scratch_operands = 0 : i64, tpu.core_type = #tpu.core_type<tc>} {
    %c0 = arith.constant 0 : index
    %c0_0 = arith.constant 0 : index
    %0 = vector.load %arg0[%c0, %c0_0] : memref<16x32xf32, #tpu.memory_space<vmem>>, vector<16x32xf32>
    %1 = arith.truncf %0 : vector<16x32xf32> to vector<16x32xbf16>
    %c0_1 = arith.constant 0 : index
    %c0_2 = arith.constant 0 : index
    %2 = vector.load %arg5[%c0_1, %c0_2] : memref<8x128xf32, #tpu.memory_space<vmem>>, vector<1x96xf32>
    %3 = vector.shape_cast %2 : vector<1x96xf32> to vector<96xf32>
    %c1 = arith.constant 1 : index
    %c0_3 = arith.constant 0 : index
    %4 = vector.load %arg5[%c1, %c0_3] : memref<8x128xf32, #tpu.memory_space<vmem>>, vector<1x32xf32>
    %5 = vector.shape_cast %4 : vector<1x32xf32> to vector<32xf32>
    %c2 = arith.constant 2 : index
    %c0_4 = arith.constant 0 : index
    %6 = vector.load %arg5[%c2, %c0_4] : memref<8x128xf32, #tpu.memory_space<vmem>>, vector<1x32xf32>
    %7 = vector.shape_cast %6 : vector<1x32xf32> to vector<32xf32>
    %c3 = arith.constant 3 : index
    %c0_5 = arith.constant 0 : index
    %8 = vector.load %arg5[%c3, %c0_5] : memref<8x128xf32, #tpu.memory_space<vmem>>, vector<1x32xf32>
    %9 = vector.shape_cast %8 : vector<1x32xf32> to vector<32xf32>
    %c4 = arith.constant 4 : index
    %c0_6 = arith.constant 0 : index
    %10 = vector.load %arg5[%c4, %c0_6] : memref<8x128xf32, #tpu.memory_space<vmem>>, vector<1x128xf32>
    %11 = vector.shape_cast %10 : vector<1x128xf32> to vector<128xf32>
    %c5 = arith.constant 5 : index
    %c0_7 = arith.constant 0 : index
    %12 = vector.load %arg5[%c5, %c0_7] : memref<8x128xf32, #tpu.memory_space<vmem>>, vector<1x32xf32>
    %13 = vector.shape_cast %12 : vector<1x32xf32> to vector<32xf32>
    %c6 = arith.constant 6 : index
    %c0_8 = arith.constant 0 : index
    %14 = vector.load %arg5[%c6, %c0_8] : memref<8x128xf32, #tpu.memory_space<vmem>>, vector<1x32xf32>
    %15 = vector.shape_cast %14 : vector<1x32xf32> to vector<32xf32>
    %c7 = arith.constant 7 : index
    %c0_9 = arith.constant 0 : index
    %16 = vector.load %arg5[%c7, %c0_9] : memref<8x128xf32, #tpu.memory_space<vmem>>, vector<1x32xf32>
    %17 = vector.shape_cast %16 : vector<1x32xf32> to vector<32xf32>
    %c0_10 = arith.constant 0 : index
    %c0_11 = arith.constant 0 : index
    %18 = vector.load %arg1[%c0_10, %c0_11] : memref<32x96xbf16, #tpu.memory_space<vmem>>, vector<32x96xbf16>
    %cst = arith.constant dense<0.000000e+00> : vector<16x96xf32>
    %19 = tpu.matmul %1, %18, %cst {dimension_numbers = #tpu.dot_dimension_numbers<[1], [0], [0], [1], [0, 0, 1, 1], [], []>} : vector<16x32xbf16>, vector<32x96xbf16>, vector<16x96xf32> -> vector<16x96xf32>
    %20 = vector.shape_cast %3 : vector<96xf32> to vector<1x96xf32>
    %21 = vector.broadcast %20 : vector<1x96xf32> to vector<16x96xf32>
    %22 = arith.addf %19, %21 : vector<16x96xf32>
    %23 = vector.extract_strided_slice %22 {offsets = [0, 0], sizes = [16, 32], strides = [1, 1]} : vector<16x96xf32> to vector<16x32xf32>
    %24 = arith.truncf %23 : vector<16x32xf32> to vector<16x32xbf16>
    %25 = vector.extract_strided_slice %22 {offsets = [0, 32], sizes = [16, 32], strides = [1, 1]} : vector<16x96xf32> to vector<16x32xf32>
    %26 = arith.truncf %25 : vector<16x32xf32> to vector<16x32xbf16>
    %27 = vector.extract_strided_slice %22 {offsets = [0, 64], sizes = [16, 32], strides = [1, 1]} : vector<16x96xf32> to vector<16x32xf32>
    %28 = arith.truncf %27 : vector<16x32xf32> to vector<16x32xbf16>
    %c0_12 = arith.constant 0 : index
    %c0_13 = arith.constant 0 : index
    %29 = vector.load %arg6[%c0_12, %c0_13] : memref<16x16xf32, #tpu.memory_space<vmem>>, vector<16x16xf32>
    %30 = vector.extract_strided_slice %24 {offsets = [0, 0], sizes = [16, 8], strides = [1, 1]} : vector<16x32xbf16> to vector<16x8xbf16>
    %31 = vector.extract_strided_slice %26 {offsets = [0, 0], sizes = [16, 8], strides = [1, 1]} : vector<16x32xbf16> to vector<16x8xbf16>
    %32 = vector.extract_strided_slice %28 {offsets = [0, 0], sizes = [16, 8], strides = [1, 1]} : vector<16x32xbf16> to vector<16x8xbf16>
    %cst_14 = arith.constant dense<0.000000e+00> : vector<16x16xf32>
    %33 = tpu.matmul %30, %31, %cst_14 {dimension_numbers = #tpu.dot_dimension_numbers<[1], [1], [0], [0], [0, 0, 1, 0], [], []>} : vector<16x8xbf16>, vector<16x8xbf16>, vector<16x16xf32> -> vector<16x16xf32>
    %34 = arith.addf %33, %29 : vector<16x16xf32>
    %cst_15 = arith.constant dense<0xFF800000> : vector<16xf32>
    %35 = vector.multi_reduction <maximumf>, %34, %cst_15 [1] : vector<16x16xf32> to vector<16xf32>
    %36 = vector.shape_cast %35 : vector<16xf32> to vector<16x1xf32>
    %37 = vector.broadcast %36 : vector<16x1xf32> to vector<16x16xf32>
    %38 = arith.subf %34, %37 : vector<16x16xf32>
    %39 = math.exp %38 : vector<16x16xf32>
    %cst_16 = arith.constant dense<0.000000e+00> : vector<16xf32>
    %40 = vector.multi_reduction <add>, %39, %cst_16 [1] : vector<16x16xf32> to vector<16xf32>
    %41 = vector.shape_cast %40 : vector<16xf32> to vector<16x1xf32>
    %42 = tpu.reciprocal %41 {approx = true} : vector<16x1xf32> -> vector<16x1xf32>
    %43 = vector.broadcast %42 : vector<16x1xf32> to vector<16x16xf32>
    %44 = arith.mulf %39, %43 : vector<16x16xf32>
    %45 = arith.truncf %44 : vector<16x16xf32> to vector<16x16xbf16>
    %cst_17 = arith.constant dense<0.000000e+00> : vector<16x8xf32>
    %46 = tpu.matmul %45, %32, %cst_17 {dimension_numbers = #tpu.dot_dimension_numbers<[1], [0], [0], [1], [0, 0, 1, 1], [], []>} : vector<16x16xbf16>, vector<16x8xbf16>, vector<16x8xf32> -> vector<16x8xf32>
    %47 = vector.extract_strided_slice %24 {offsets = [0, 8], sizes = [16, 8], strides = [1, 1]} : vector<16x32xbf16> to vector<16x8xbf16>
    %48 = vector.extract_strided_slice %26 {offsets = [0, 8], sizes = [16, 8], strides = [1, 1]} : vector<16x32xbf16> to vector<16x8xbf16>
    %49 = vector.extract_strided_slice %28 {offsets = [0, 8], sizes = [16, 8], strides = [1, 1]} : vector<16x32xbf16> to vector<16x8xbf16>
    %cst_18 = arith.constant dense<0.000000e+00> : vector<16x16xf32>
    %50 = tpu.matmul %47, %48, %cst_18 {dimension_numbers = #tpu.dot_dimension_numbers<[1], [1], [0], [0], [0, 0, 1, 0], [], []>} : vector<16x8xbf16>, vector<16x8xbf16>, vector<16x16xf32> -> vector<16x16xf32>
    %51 = arith.addf %50, %29 : vector<16x16xf32>
    %cst_19 = arith.constant dense<0xFF800000> : vector<16xf32>
    %52 = vector.multi_reduction <maximumf>, %51, %cst_19 [1] : vector<16x16xf32> to vector<16xf32>
    %53 = vector.shape_cast %52 : vector<16xf32> to vector<16x1xf32>
    %54 = vector.broadcast %53 : vector<16x1xf32> to vector<16x16xf32>
    %55 = arith.subf %51, %54 : vector<16x16xf32>
    %56 = math.exp %55 : vector<16x16xf32>
    %cst_20 = arith.constant dense<0.000000e+00> : vector<16xf32>
    %57 = vector.multi_reduction <add>, %56, %cst_20 [1] : vector<16x16xf32> to vector<16xf32>
    %58 = vector.shape_cast %57 : vector<16xf32> to vector<16x1xf32>
    %59 = tpu.reciprocal %58 {approx = true} : vector<16x1xf32> -> vector<16x1xf32>
    %60 = vector.broadcast %59 : vector<16x1xf32> to vector<16x16xf32>
    %61 = arith.mulf %56, %60 : vector<16x16xf32>
    %62 = arith.truncf %61 : vector<16x16xf32> to vector<16x16xbf16>
    %cst_21 = arith.constant dense<0.000000e+00> : vector<16x8xf32>
    %63 = tpu.matmul %62, %49, %cst_21 {dimension_numbers = #tpu.dot_dimension_numbers<[1], [0], [0], [1], [0, 0, 1, 1], [], []>} : vector<16x16xbf16>, vector<16x8xbf16>, vector<16x8xf32> -> vector<16x8xf32>
    %64 = vector.extract_strided_slice %24 {offsets = [0, 16], sizes = [16, 8], strides = [1, 1]} : vector<16x32xbf16> to vector<16x8xbf16>
    %65 = vector.extract_strided_slice %26 {offsets = [0, 16], sizes = [16, 8], strides = [1, 1]} : vector<16x32xbf16> to vector<16x8xbf16>
    %66 = vector.extract_strided_slice %28 {offsets = [0, 16], sizes = [16, 8], strides = [1, 1]} : vector<16x32xbf16> to vector<16x8xbf16>
    %cst_22 = arith.constant dense<0.000000e+00> : vector<16x16xf32>
    %67 = tpu.matmul %64, %65, %cst_22 {dimension_numbers = #tpu.dot_dimension_numbers<[1], [1], [0], [0], [0, 0, 1, 0], [], []>} : vector<16x8xbf16>, vector<16x8xbf16>, vector<16x16xf32> -> vector<16x16xf32>
    %68 = arith.addf %67, %29 : vector<16x16xf32>
    %cst_23 = arith.constant dense<0xFF800000> : vector<16xf32>
    %69 = vector.multi_reduction <maximumf>, %68, %cst_23 [1] : vector<16x16xf32> to vector<16xf32>
    %70 = vector.shape_cast %69 : vector<16xf32> to vector<16x1xf32>
    %71 = vector.broadcast %70 : vector<16x1xf32> to vector<16x16xf32>
    %72 = arith.subf %68, %71 : vector<16x16xf32>
    %73 = math.exp %72 : vector<16x16xf32>
    %cst_24 = arith.constant dense<0.000000e+00> : vector<16xf32>
    %74 = vector.multi_reduction <add>, %73, %cst_24 [1] : vector<16x16xf32> to vector<16xf32>
    %75 = vector.shape_cast %74 : vector<16xf32> to vector<16x1xf32>
    %76 = tpu.reciprocal %75 {approx = true} : vector<16x1xf32> -> vector<16x1xf32>
    %77 = vector.broadcast %76 : vector<16x1xf32> to vector<16x16xf32>
    %78 = arith.mulf %73, %77 : vector<16x16xf32>
    %79 = arith.truncf %78 : vector<16x16xf32> to vector<16x16xbf16>
    %cst_25 = arith.constant dense<0.000000e+00> : vector<16x8xf32>
    %80 = tpu.matmul %79, %66, %cst_25 {dimension_numbers = #tpu.dot_dimension_numbers<[1], [0], [0], [1], [0, 0, 1, 1], [], []>} : vector<16x16xbf16>, vector<16x8xbf16>, vector<16x8xf32> -> vector<16x8xf32>
    %81 = vector.extract_strided_slice %24 {offsets = [0, 24], sizes = [16, 8], strides = [1, 1]} : vector<16x32xbf16> to vector<16x8xbf16>
    %82 = vector.extract_strided_slice %26 {offsets = [0, 24], sizes = [16, 8], strides = [1, 1]} : vector<16x32xbf16> to vector<16x8xbf16>
    %83 = vector.extract_strided_slice %28 {offsets = [0, 24], sizes = [16, 8], strides = [1, 1]} : vector<16x32xbf16> to vector<16x8xbf16>
    %cst_26 = arith.constant dense<0.000000e+00> : vector<16x16xf32>
    %84 = tpu.matmul %81, %82, %cst_26 {dimension_numbers = #tpu.dot_dimension_numbers<[1], [1], [0], [0], [0, 0, 1, 0], [], []>} : vector<16x8xbf16>, vector<16x8xbf16>, vector<16x16xf32> -> vector<16x16xf32>
    %85 = arith.addf %84, %29 : vector<16x16xf32>
    %cst_27 = arith.constant dense<0xFF800000> : vector<16xf32>
    %86 = vector.multi_reduction <maximumf>, %85, %cst_27 [1] : vector<16x16xf32> to vector<16xf32>
    %87 = vector.shape_cast %86 : vector<16xf32> to vector<16x1xf32>
    %88 = vector.broadcast %87 : vector<16x1xf32> to vector<16x16xf32>
    %89 = arith.subf %85, %88 : vector<16x16xf32>
    %90 = math.exp %89 : vector<16x16xf32>
    %cst_28 = arith.constant dense<0.000000e+00> : vector<16xf32>
    %91 = vector.multi_reduction <add>, %90, %cst_28 [1] : vector<16x16xf32> to vector<16xf32>
    %92 = vector.shape_cast %91 : vector<16xf32> to vector<16x1xf32>
    %93 = tpu.reciprocal %92 {approx = true} : vector<16x1xf32> -> vector<16x1xf32>
    %94 = vector.broadcast %93 : vector<16x1xf32> to vector<16x16xf32>
    %95 = arith.mulf %90, %94 : vector<16x16xf32>
    %96 = arith.truncf %95 : vector<16x16xf32> to vector<16x16xbf16>
    %cst_29 = arith.constant dense<0.000000e+00> : vector<16x8xf32>
    %97 = tpu.matmul %96, %83, %cst_29 {dimension_numbers = #tpu.dot_dimension_numbers<[1], [0], [0], [1], [0, 0, 1, 1], [], []>} : vector<16x16xbf16>, vector<16x8xbf16>, vector<16x8xf32> -> vector<16x8xf32>
    %98 = tpu.concatenate %46, %63, %80, %97 in 1 : vector<16x8xf32>, vector<16x8xf32>, vector<16x8xf32>, vector<16x8xf32> -> vector<16x32xf32>
    %99 = arith.truncf %98 : vector<16x32xf32> to vector<16x32xbf16>
    %c0_30 = arith.constant 0 : index
    %c0_31 = arith.constant 0 : index
    %100 = vector.load %arg2[%c0_30, %c0_31] : memref<32x32xbf16, #tpu.memory_space<vmem>>, vector<32x32xbf16>
    %cst_32 = arith.constant dense<0.000000e+00> : vector<16x32xf32>
    %101 = tpu.matmul %99, %100, %cst_32 {dimension_numbers = #tpu.dot_dimension_numbers<[1], [0], [0], [1], [0, 0, 1, 1], [], []>} : vector<16x32xbf16>, vector<32x32xbf16>, vector<16x32xf32> -> vector<16x32xf32>
    %102 = vector.shape_cast %5 : vector<32xf32> to vector<1x32xf32>
    %103 = vector.broadcast %102 : vector<1x32xf32> to vector<16x32xf32>
    %104 = arith.addf %101, %103 : vector<16x32xf32>
    %105 = arith.addf %0, %104 : vector<16x32xf32>
    %cst_33 = arith.constant dense<0.000000e+00> : vector<16xf32>
    %106 = vector.multi_reduction <add>, %105, %cst_33 [1] : vector<16x32xf32> to vector<16xf32>
    %107 = vector.shape_cast %106 : vector<16xf32> to vector<16x1xf32>
    %cst_34 = arith.constant 3.200000e+01 : f32
    %108 = vector.broadcast %cst_34 : f32 to vector<16x1xf32>
    %109 = arith.divf %107, %108 : vector<16x1xf32>
    %110 = vector.broadcast %109 : vector<16x1xf32> to vector<16x32xf32>
    %111 = arith.subf %105, %110 : vector<16x32xf32>
    %112 = arith.mulf %111, %111 : vector<16x32xf32>
    %cst_35 = arith.constant dense<0.000000e+00> : vector<16xf32>
    %113 = vector.multi_reduction <add>, %112, %cst_35 [1] : vector<16x32xf32> to vector<16xf32>
    %114 = vector.shape_cast %113 : vector<16xf32> to vector<16x1xf32>
    %cst_36 = arith.constant 3.200000e+01 : f32
    %115 = vector.broadcast %cst_36 : f32 to vector<16x1xf32>
    %116 = arith.divf %114, %115 : vector<16x1xf32>
    %117 = vector.broadcast %109 : vector<16x1xf32> to vector<16x32xf32>
    %118 = arith.subf %105, %117 : vector<16x32xf32>
    %cst_37 = arith.constant 9.99999974E-6 : f32
    %119 = vector.broadcast %cst_37 : f32 to vector<16x1xf32>
    %120 = arith.addf %116, %119 : vector<16x1xf32>
    %121 = math.rsqrt %120 : vector<16x1xf32>
    %122 = vector.broadcast %121 : vector<16x1xf32> to vector<16x32xf32>
    %123 = arith.mulf %118, %122 : vector<16x32xf32>
    %124 = vector.shape_cast %7 : vector<32xf32> to vector<1x32xf32>
    %125 = vector.broadcast %124 : vector<1x32xf32> to vector<16x32xf32>
    %126 = arith.mulf %123, %125 : vector<16x32xf32>
    %127 = vector.shape_cast %9 : vector<32xf32> to vector<1x32xf32>
    %128 = vector.broadcast %127 : vector<1x32xf32> to vector<16x32xf32>
    %129 = arith.addf %126, %128 : vector<16x32xf32>
    %130 = arith.truncf %129 : vector<16x32xf32> to vector<16x32xbf16>
    %c0_38 = arith.constant 0 : index
    %c0_39 = arith.constant 0 : index
    %131 = vector.load %arg3[%c0_38, %c0_39] : memref<32x128xbf16, #tpu.memory_space<vmem>>, vector<32x128xbf16>
    %cst_40 = arith.constant dense<0.000000e+00> : vector<16x128xf32>
    %132 = tpu.matmul %130, %131, %cst_40 {dimension_numbers = #tpu.dot_dimension_numbers<[1], [0], [0], [1], [0, 0, 1, 1], [], []>} : vector<16x32xbf16>, vector<32x128xbf16>, vector<16x128xf32> -> vector<16x128xf32>
    %133 = vector.shape_cast %11 : vector<128xf32> to vector<1x128xf32>
    %134 = vector.broadcast %133 : vector<1x128xf32> to vector<16x128xf32>
    %135 = arith.addf %132, %134 : vector<16x128xf32>
    %cst_41 = arith.constant 5.000000e-01 : f32
    %136 = vector.broadcast %cst_41 : f32 to vector<16x128xf32>
    %137 = arith.mulf %136, %135 : vector<16x128xf32>
    %cst_42 = arith.constant 0.707106769 : f32
    %138 = vector.broadcast %cst_42 : f32 to vector<16x128xf32>
    %139 = arith.mulf %135, %138 : vector<16x128xf32>
    %140 = math.erf %139 : vector<16x128xf32>
    %cst_43 = arith.constant 1.000000e+00 : f32
    %141 = vector.broadcast %cst_43 : f32 to vector<16x128xf32>
    %142 = arith.addf %141, %140 : vector<16x128xf32>
    %143 = arith.mulf %137, %142 : vector<16x128xf32>
    %144 = arith.truncf %143 : vector<16x128xf32> to vector<16x128xbf16>
    %c0_44 = arith.constant 0 : index
    %c0_45 = arith.constant 0 : index
    %145 = vector.load %arg4[%c0_44, %c0_45] : memref<128x32xbf16, #tpu.memory_space<vmem>>, vector<128x32xbf16>
    %cst_46 = arith.constant dense<0.000000e+00> : vector<16x32xf32>
    %146 = tpu.matmul %144, %145, %cst_46 {dimension_numbers = #tpu.dot_dimension_numbers<[1], [0], [0], [1], [0, 0, 1, 1], [], []>} : vector<16x128xbf16>, vector<128x32xbf16>, vector<16x32xf32> -> vector<16x32xf32>
    %147 = vector.shape_cast %13 : vector<32xf32> to vector<1x32xf32>
    %148 = vector.broadcast %147 : vector<1x32xf32> to vector<16x32xf32>
    %149 = arith.addf %146, %148 : vector<16x32xf32>
    %150 = arith.addf %129, %149 : vector<16x32xf32>
    %cst_47 = arith.constant dense<0.000000e+00> : vector<16xf32>
    %151 = vector.multi_reduction <add>, %150, %cst_47 [1] : vector<16x32xf32> to vector<16xf32>
    %152 = vector.shape_cast %151 : vector<16xf32> to vector<16x1xf32>
    %cst_48 = arith.constant 3.200000e+01 : f32
    %153 = vector.broadcast %cst_48 : f32 to vector<16x1xf32>
    %154 = arith.divf %152, %153 : vector<16x1xf32>
    %155 = vector.broadcast %154 : vector<16x1xf32> to vector<16x32xf32>
    %156 = arith.subf %150, %155 : vector<16x32xf32>
    %157 = arith.mulf %156, %156 : vector<16x32xf32>
    %cst_49 = arith.constant dense<0.000000e+00> : vector<16xf32>
    %158 = vector.multi_reduction <add>, %157, %cst_49 [1] : vector<16x32xf32> to vector<16xf32>
    %159 = vector.shape_cast %158 : vector<16xf32> to vector<16x1xf32>
    %cst_50 = arith.constant 3.200000e+01 : f32
    %160 = vector.broadcast %cst_50 : f32 to vector<16x1xf32>
    %161 = arith.divf %159, %160 : vector<16x1xf32>
    %162 = vector.broadcast %154 : vector<16x1xf32> to vector<16x32xf32>
    %163 = arith.subf %150, %162 : vector<16x32xf32>
    %cst_51 = arith.constant 9.99999974E-6 : f32
    %164 = vector.broadcast %cst_51 : f32 to vector<16x1xf32>
    %165 = arith.addf %161, %164 : vector<16x1xf32>
    %166 = math.rsqrt %165 : vector<16x1xf32>
    %167 = vector.broadcast %166 : vector<16x1xf32> to vector<16x32xf32>
    %168 = arith.mulf %163, %167 : vector<16x32xf32>
    %169 = vector.shape_cast %15 : vector<32xf32> to vector<1x32xf32>
    %170 = vector.broadcast %169 : vector<1x32xf32> to vector<16x32xf32>
    %171 = arith.mulf %168, %170 : vector<16x32xf32>
    %172 = vector.shape_cast %17 : vector<32xf32> to vector<1x32xf32>
    %173 = vector.broadcast %172 : vector<1x32xf32> to vector<16x32xf32>
    %174 = arith.addf %171, %173 : vector<16x32xf32>
    %c0_52 = arith.constant 0 : index
    %c0_53 = arith.constant 0 : index
    %175 = vector.load %arg7[%c0_52, %c0_53] : memref<16x32xf32, #tpu.memory_space<vmem>>, vector<16x32xf32>
    tpu.vector_store %arg7[%c0_52, %c0_53], %174 {strides = array<i32>} : memref<16x32xf32, #tpu.memory_space<vmem>>, vector<16x32xf32>,
    return
  }
}

</mosaic_0001>

<bundles_post_ra>
// kernel: tpu_custom_call.1
= control target key start
LH: loop header
LB: loop body
LE: loop exit
PB: predicated region body
PF: predicated region fallthrough
CT: control target
= control target key end

     0   :  { %12 = vsyncpa [#allocation3], 0  ;;  %s1233_s0 = inlined_call_operand.vmem [shape: f32[16,32], index: 0, kind: input, shape index: {}]   ;;  %s1234_s1 = inlined_call_operand.vmem [shape: bf16[32,96], index: 1, kind: input, shape index: {}]   ;;  %s1235_s2 = inlined_call_operand.vmem [shape: bf16[32,32], index: 2, kind: input, shape index: {}]   ;;  %s1236_s3 = inlined_call_operand.vmem [shape: bf16[32,128], index: 3, kind: input, shape index: {}]   ;;  %s1237_s4 = inlined_call_operand.vmem [shape: bf16[128,32], index: 4, kind: input, shape index: {}]   ;;  %s1238_s5 = inlined_call_operand.hbm [shape: f32[8,128], index: 5, kind: input, shape index: {}]   ;;  %s1239_s6 = inlined_call_operand.vmem [shape: f32[16,16], index: 6, kind: input, shape index: {}]   ;;  %s1240_s7 = inlined_call_operand.hbm [shape: f32[16,32], index: 7, kind: output, shape index: {}]  }
   0x1   :  { %13 = vsyncpa [#allocation4], 0  ;;  %s29_s26 = sshll.u32 %s1238_s5, 4  ;;  %s988_s27 = smov [#allocation2]   ;;  %s30_s26 = int_to_ptr.hbm [resolvable:$true] %s29_s26 }
   0x2   :  { %s31_s28 = sshll.u32 %s988_s27, 4  ;;  %s32_s28 = int_to_ptr.vmem [resolvable:$true] %s31_s28 }
   0x3   :  { %34 = dma.hbm_to_vmem [thread:$0]  %s30_s26, 128, %s32_s28, [#allocation3]  }
   0x4   :  { %984 = dma.done.wait [#allocation3], 128  }
   0x5   :  { %985 = vsyncadd [#allocation3], 4294967168  ;;  %v836_v0 = vld [vmem:[%s1234_s1 + $0x8] sm:$0xff]  ;;  %v835_v1 = vld [vmem:[%s1234_s1] sm:$0xff]  ;;  %vm70_vm0 = vcmask 261120   ;;  %s990_s1 = smov 96  }
   0x6   :  { %v1058_v2 = vld [vmem:[%s1233_s0] sm:$0xff]  ;;  %v1063_v3 = vld [vmem:[%s1233_s0 + $0x8] sm:$0xff]  ;;  %80 = vmatpush.bf16.msra.mxu0 %v836_v0  ;;  %s989_s0 = smov 64   ;;  %s991_s13 = smov 120   ;;  %vm99_vm1 = vcmask 64512   ;;  %vm120_vm2 = vcmask 130048  }
   0x7   :  { %v44_v4 = vpack.c.bf16 %v1063_v3, %v1058_v2  ;;  %v882_v6 = vld [vmem:[#allocation2] ss:$0 sm:$0xff]  ;;  %v1086_v22 = vld [vmem:[%s1239_s6 + $0x8] sm:$0xff]  ;;  %s993_s18 = smov 72   ;;  %s994_s19 = smov 104   ;;  %vm393_vm3 = vcmask 195584  }
   0x8   :  { %v1079_v18 = vld [vmem:[%s1239_s6] sm:$0xff]  ;;  %s992_s6 = smov 88   ;;  %s995_s20 = smov 80  }
   0x9   :  { %s996_s21 = smov 112   ;;  %s997_s22 = smov 56  }
   0xa   :  { %81 = vmatpush.bf16.msra.mxu0 %v835_v1  ;;  %s998_s23 = smov 48   ;;  %s999_s24 = smov 40  }
   0xb   :  { %s1000_s25 = smov 8   ;;  %s1001_s26 = smov 16  }
   0xc   :  { %s1002_s27 = smov 24   ;;  %s1005_s28 = smov 128  }
   0xd   :  { %774 = vmatmul.msk.bf16.vlgmr.msra.gmra.mxu0 %vm70_vm0, %v44_v4 }
  0x8a   :  { %v83_v5 = vpop.f32.mrf.mxu0 }
  0x8b   :  { %v84_v7 = vadd.f32 %v882_v6, %v83_v5 }
  0x8d   :  { %v88_v9 = vpack.c.bf16 %v84_v7, %v84_v7 }
  0x8f   :  { %v94_v12 = vunpack.c.l.b16 %v88_v9 }
  0x92   :  { %v85_v8 = vpop.f32.mrf.mxu0 }
  0x93   :  { %v86_v10 = vadd.f32 %v882_v6, %v85_v8 }
  0x95   :  { %v89_v11 = vpack.c.bf16 %v86_v10, %v86_v10 }
  0x97   :  { %v95_v13 = vunpack.c.l.b16 %v89_v11 }
  0x99   :  { %v1068_v14 = vpack.c.b16 %v95_v13, %v94_v12 }
  0x9b   :  { %144 = vrot.lane.b32.xlu2 %v1068_v14, %s989_s0  ;;  %97 = vrot.lane.b32.xlu0 %v1068_v14, %s990_s1 }
  0xa3   :  { %164 = vrot.lane.b32.xlu2 %v1068_v14, %s991_s13 }
  0xf5   :  { %v145_v15 = vpop.permute.xlu2 %144 }
  0xf6   :  { %157 = vmatpush.bf16.msra.mxu2 %v145_v15 }
  0xfd   :  { %v165_v36 = vpop.permute.xlu2 %164 }
 0x10d   :  { %v98_v16 = vpop.permute.xlu0 %97 }
 0x10e   :  { %v104_v17 = vsel %vm99_vm1, %v98_v16, 0 }
 0x10f   :  { %113 = vmatpush.bf16.xpose.msra.mxu1 %v104_v17 }
 0x116   :  { %775 = vmatmul.msk.bf16.vlgmr.msra.gmra.mxu1 %vm99_vm1, %v1068_v14 }
 0x193   :  { %v115_v19 = vpop.f32.mrf.mxu1 }
 0x194   :  { %v116_v20 = vadd.f32 %v115_v19, %v1079_v18 }
 0x196   :  { %v121_v21 = vsel %vm120_vm2, %v116_v20, -inf }
 0x197   :  { %122 = vmax.xlane.f32.xlu0 %v121_v21 }
 0x19b   :  { %v117_v23 = vpop.f32.mrf.mxu1 }
 0x19c   :  { %v118_v24 = vadd.f32 %v117_v23, %v1086_v22 }
 0x19e   :  { %v124_v25 = vsel %vm120_vm2, %v118_v24, -inf }
 0x19f   :  { %125 = vmax.xlane.f32.xlu1 %v124_v25 }
 0x20a   :  { %v123_v26 = vpop.xlane.xlu0 %122 }
 0x20b   :  { %v127_v27 = vsub.f32 %v116_v20, %v123_v26 }
 0x20d   :  { %v129_v28 = vmul.f32 1.442695, %v127_v27 }
 0x20f   :  { %890 = vpow2.f32 %v129_v28 }
 0x212   :  { %v126_v29 = vpop.xlane.xlu1 %125 }
 0x213   :  { %v128_v30 = vsub.f32 %v118_v24, %v126_v29 }
 0x215   :  { %v891_v31 = vpop.eup %890  ;;  %v131_v32 = vmul.f32 1.442695, %v128_v30 }
 0x216   :  { %v133_v33 = vsel %vm120_vm2, %v891_v31, 0.0 }
 0x217   :  { %892 = vpow2.f32 %v131_v32  ;;  %134 = vadd.xlane.f32.xlu1 %v133_v33 }
 0x21d   :  { %v893_v34 = vpop.eup %892 }
 0x21e   :  { %v136_v35 = vsel %vm120_vm2, %v893_v34, 0.0 }
 0x21f   :  { %137 = vadd.xlane.f32.xlu2 %v136_v35 }
 0x230   :  { %166 = vrot.lane.b32.xlu1 %v1068_v14, %s992_s6 }
 0x237   :  { %300 = vrot.lane.b32.xlu2 %v1068_v14, %s993_s18 }
 0x238   :  { %298 = vrot.lane.b32.xlu1 %v1068_v14, %s994_s19 }
 0x23f   :  { %233 = vrot.lane.b32.xlu2 %v1068_v14, %s995_s20 }
 0x240   :  { %231 = vrot.lane.b32.xlu1 %v1068_v14, %s996_s21 }
 0x28a   :  { %v135_v37 = vpop.xlane.xlu1 %134 }
 0x28b   :  { %894 = vrcp.f32 %v135_v37 }
 0x291   :  { %v895_v39 = vpop.eup %894 }
 0x292   :  { %v138_v38 = vpop.xlane.xlu2 %137  ;;  %v141_v42 = vmul.f32 %v895_v39, %v891_v31 }
 0x293   :  { %896 = vrcp.f32 %v138_v38 }
 0x299   :  { %v897_v40 = vpop.eup %896 }
 0x29a   :  { %v301_v41 = vpop.permute.xlu2 %300  ;;  %v142_v43 = vmul.f32 %v897_v40, %v893_v34 }
 0x29b   :  { %v306_v44 = vsel %vm99_vm1, %v301_v41, 0 }
 0x29c   :  { %315 = vmatpush.bf16.xpose.msra.mxu3 %v306_v44  ;;  %v143_v45 = vpack.c.bf16 %v142_v43, %v141_v42 }
 0x29e   :  { %776 = vmatmul.msk.bf16.vlgmr.msra.gmra.mxu2 %vm120_vm2, %v143_v45 }
 0x2a2   :  { %v234_v46 = vpop.permute.xlu2 %233  ;;  %v167_v47 = vpop.permute.xlu1 %166 }
 0x2a3   :  { %v172_v48 = vsel %vm99_vm1, %v167_v47, 0  ;;  %v239_v49 = vsel %vm99_vm1, %v234_v46, 0 }
 0x2a4   :  { %181 = vmatpush.bf16.xpose.msrb.mxu2 %v172_v48  ;;  %248 = vmatpush.bf16.xpose.msrb.mxu0 %v239_v49 }
 0x2aa   :  { %v299_v50 = vpop.permute.xlu1 %298 }
 0x2ab   :  { %781 = vmatmul.msk.bf16.vlgmr.msra.gmra.mxu3 %vm99_vm1, %v299_v50 }
 0x2ae   :  { %777 = vmatmul.msk.bf16.vlgmr.msrb.gmra.mxu2 %vm99_vm1, %v165_v36 }
 0x2b2   :  { %v232_v51 = vpop.permute.xlu1 %231 }
 0x2b3   :  { %779 = vmatmul.msk.bf16.vlgmr.msrb.gmra.mxu0 %vm99_vm1, %v232_v51 }
 0x321   :  { %v1104_v52 = vpop.f32.mrf.mxu2 }
 0x329   :  { %v1106_v53 = vpop.f32.mrf.mxu2 }
 0x32e   :  { %v317_v54 = vpop.f32.mrf.mxu3 }
 0x32f   :  { %v318_v55 = vadd.f32 %v317_v54, %v1079_v18 }
 0x330   :  { %v250_v0 = vpop.f32.mrf.mxu0 }
 0x331   :  { %v183_v56 = vpop.f32.mrf.mxu2  ;;  %v322_v57 = vsel %vm120_vm2, %v318_v55, -inf  ;;  %v251_v5 = vadd.f32 %v250_v0, %v1079_v18 }
 0x332   :  { %v184_v58 = vadd.f32 %v183_v56, %v1079_v18  ;;  %323 = vmax.xlane.f32.xlu1 %v322_v57 }
 0x333   :  { %v255_v6 = vsel %vm120_vm2, %v251_v5, -inf }
 0x334   :  { %v188_v59 = vsel %vm120_vm2, %v184_v58, -inf }
 0x335   :  { %189 = vmax.xlane.f32.xlu0 %v188_v59 }
 0x336   :  { %v319_v60 = vpop.f32.mrf.mxu3 }
 0x337   :  { %v320_v61 = vadd.f32 %v319_v60, %v1086_v22 }
 0x338   :  { %v252_v7 = vpop.f32.mrf.mxu0 }
 0x339   :  { %v185_v62 = vpop.f32.mrf.mxu2  ;;  %v325_v4 = vsel %vm120_vm2, %v320_v61, -inf  ;;  %v253_v8 = vadd.f32 %v252_v7, %v1086_v22 }
 0x33a   :  { %v186_v63 = vadd.f32 %v185_v62, %v1086_v22 }
 0x33b   :  { %v258_v9 = vsel %vm120_vm2, %v253_v8, -inf }
 0x33c   :  { %v191_v1 = vsel %vm120_vm2, %v186_v63, -inf }
 0x33d   :  { %192 = vmax.xlane.f32.xlu2 %v191_v1  ;;  %326 = vmax.xlane.f32.xlu0 %v325_v4 }
 0x345   :  { %256 = vmax.xlane.f32.xlu0 %v255_v6 }
 0x34d   :  { %259 = vmax.xlane.f32.xlu0 %v258_v9 }
 0x355   :  { %211 = vrot.lane.b32.xlu2 %v1068_v14, %s997_s22 }
 0x3a5   :  { %v324_v10 = vpop.xlane.xlu1 %323 }
 0x3a6   :  { %v328_v11 = vsub.f32 %v318_v55, %v324_v10 }
 0x3a8   :  { %v330_v12 = vmul.f32 1.442695, %v328_v11  ;;  %v190_v13 = vpop.xlane.xlu0 %189 }
 0x3a9   :  { %v194_v24 = vsub.f32 %v184_v58, %v190_v13  ;;  %v838_v13 = vld [vmem:[%s1235_s2 + $0x8] sm:$0xff] }
 0x3aa   :  { %898 = vpow2.f32 %v330_v12  ;;  %423 = vmatpush.bf16.msra.mxu0 %v838_v13  ;;  %v884_v13 = vld [vmem:[#allocation2 + $0x2] ss:$0 sm:$0xff] }
 0x3ab   :  { %v196_v28 = vmul.f32 1.442695, %v194_v24 }
 0x3b0   :  { %v1121_v15 = vpop.eup %898  ;;  %v193_v16 = vpop.xlane.xlu2 %192 }
 0x3b1   :  { %v327_v17 = vpop.xlane.xlu0 %326  ;;  %v334_v19 = vsel %vm120_vm2, %v1121_v15, 0.0  ;;  %v195_v32 = vsub.f32 %v186_v63, %v193_v16 }
 0x3b2   :  { %v329_v18 = vsub.f32 %v320_v61, %v327_v17  ;;  %335 = vadd.xlane.f32.xlu0 %v334_v19 }
 0x3b3   :  { %v198_v35 = vmul.f32 1.442695, %v195_v32  ;;  %v883_v32 = vld [vmem:[#allocation2 + $0x1] ss:$0 sm:$0xff] }
 0x3b4   :  { %v332_v20 = vmul.f32 1.442695, %v329_v18 }
 0x3b6   :  { %900 = vpow2.f32 %v332_v20 }
 0x3b8   :  { %v212_v21 = vpop.permute.xlu2 %211 }
 0x3b9   :  { %v257_v22 = vpop.xlane.xlu0 %256  ;;  %224 = vmatpush.bf16.msra.mxu2 %v212_v21 }
 0x3ba   :  { %v261_v23 = vsub.f32 %v251_v5, %v257_v22 }
 0x3bc   :  { %v263_v25 = vmul.f32 1.442695, %v261_v23  ;;  %v901_v26 = vpop.eup %900 }
 0x3bd   :  { %v337_v27 = vsel %vm120_vm2, %v901_v26, 0.0 }
 0x3be   :  { %902 = vpow2.f32 %v263_v25  ;;  %338 = vadd.xlane.f32.xlu1 %v337_v27 }
 0x3bf   :  { %904 = vpow2.f32 %v196_v28 }
 0x3c1   :  { %v260_v29 = vpop.xlane.xlu0 %259 }
 0x3c2   :  { %v262_v30 = vsub.f32 %v253_v8, %v260_v29 }
 0x3c4   :  { %v903_v31 = vpop.eup %902  ;;  %v265_v33 = vmul.f32 1.442695, %v262_v30 }
 0x3c5   :  { %v267_v34 = vsel %vm120_vm2, %v903_v31, 0.0  ;;  %v905_v36 = vpop.eup %904 }
 0x3c6   :  { %906 = vpow2.f32 %v265_v33  ;;  %268 = vadd.xlane.f32.xlu0 %v267_v34  ;;  %v200_v39 = vsel %vm120_vm2, %v905_v36, 0.0 }
 0x3c7   :  { %908 = vpow2.f32 %v198_v35 }
 0x3cc   :  { %v907_v37 = vpop.eup %906 }
 0x3cd   :  { %v270_v38 = vsel %vm120_vm2, %v907_v37, 0.0  ;;  %v909_v40 = vpop.eup %908 }
 0x3ce   :  { %271 = vadd.xlane.f32.xlu1 %v270_v38  ;;  %201 = vadd.xlane.f32.xlu0 %v200_v39  ;;  %v203_v41 = vsel %vm120_vm2, %v909_v40, 0.0  ;;  %v1003_v39 = vmov 32.0  }
 0x3d6   :  { %204 = vadd.xlane.f32.xlu0 %v203_v41 }
 0x3e7   :  { %278 = vrot.lane.b32.xlu1 %v1068_v14, %s998_s23 }
 0x3ea   :  { %345 = vrot.lane.b32.xlu0 %v1068_v14, %s999_s24 }
 0x425   :  { %v336_v42 = vpop.xlane.xlu0 %335 }
 0x431   :  { %v339_v45 = vpop.xlane.xlu1 %338 }
 0x439   :  { %v269_v43 = vpop.xlane.xlu0 %268 }
 0x441   :  { %v202_v44 = vpop.xlane.xlu0 %201  ;;  %v272_v47 = vpop.xlane.xlu1 %271 }
 0x442   :  { %910 = vrcp.f32 %v202_v44 }
 0x448   :  { %v911_v48 = vpop.eup %910 }
 0x449   :  { %v205_v46 = vpop.xlane.xlu0 %204  ;;  %v208_v50 = vmul.f32 %v911_v48, %v905_v36 }
 0x44a   :  { %912 = vrcp.f32 %v205_v46 }
 0x44b   :  { %914 = vrcp.f32 %v272_v47 }
 0x44c   :  { %916 = vrcp.f32 %v269_v43 }
 0x44d   :  { %918 = vrcp.f32 %v339_v45 }
 0x44e   :  { %920 = vrcp.f32 %v336_v42 }
 0x44f   :  { %922 = vrcp.f32 %v1003_v39 }
 0x450   :  { %v913_v49 = vpop.eup %912 }
 0x451   :  { %v209_v51 = vmul.f32 %v913_v49, %v909_v40  ;;  %v915_v55 = vpop.eup %914 }
 0x452   :  { %v917_v56 = vpop.eup %916  ;;  %v276_v14 = vmul.f32 %v915_v55, %v907_v37 }
 0x453   :  { %v210_v54 = vpack.c.bf16 %v209_v51, %v208_v50  ;;  %v275_v57 = vmul.f32 %v917_v56, %v903_v31  ;;  %v919_v60 = vpop.eup %918  ;;  %v840_v56 = vld [vmem:[%s1236_s3 + $0x8] sm:$0xff] }
 0x454   :  { %v921_v62 = vpop.eup %920  ;;  %v343_v63 = vmul.f32 %v919_v60, %v901_v26 }
 0x455   :  { %778 = vmatmul.msk.bf16.vlgmr.msra.gmra.mxu2 %vm120_vm2, %v210_v54  ;;  %v277_v59 = vpack.c.bf16 %v276_v14, %v275_v57  ;;  %v342_v0 = vmul.f32 %v921_v62, %v1121_v15  ;;  %v837_v15 = vld [vmem:[%s1235_s2] sm:$0xff]  ;;  %v923_v40 = vpop.eup %922 }
 0x456   :  { %424 = vmatpush.bf16.msra.mxu0 %v837_v15  ;;  %v440_v41 = vmul.f32 32.0, %v923_v40  ;;  %vm444_vm4 = vweird.f32 %v923_v40 }
 0x457   :  { %v344_v1 = vpack.c.bf16 %v343_v63, %v342_v0 }
 0x458   :  { %v441_v42 = vsub.f32 1.0, %v440_v41 }
 0x459   :  { %v279_v58 = vpop.permute.xlu1 %278 }
 0x45a   :  { %291 = vmatpush.bf16.msrb.mxu1 %v279_v58  ;;  %v442_v43 = vmul.f32 %v923_v40, %v441_v42 }
 0x45c   :  { %v346_v61 = vpop.permute.xlu0 %345  ;;  %v443_v44 = vadd.f32 %v923_v40, %v442_v43 }
 0x45d   :  { %780 = vmatmul.msk.bf16.vlgmr.msrb.gmra.mxu1 %vm120_vm2, %v277_v59  ;;  %358 = vmatpush.bf16.msrb.mxu2 %v346_v61  ;;  %v839_v59 = vld [vmem:[%s1236_s3] sm:$0xff] }
 0x45e   :  { %v1154_v45 = vsel %vm444_vm4, %v923_v40, %v443_v44  ;;  %517 = vmatpush.bf16.msra.mxu1 %v840_v56  ;;  %v845_v40 = vld [vmem:[%s1237_s4 + $0x20] sm:$0xff] }
 0x462   :  { %518 = vmatpush.bf16.msra.mxu1 %v839_v59 }
 0x465   :  { %782 = vmatmul.msk.bf16.vlgmr.msrb.gmra.mxu2 %vm120_vm2, %v344_v1 }
 0x4d8   :  { %v226_v4 = vpop.f32.mrf.mxu2 }
 0x4da   :  { %v293_v5 = vpop.f32.mrf.mxu1 }
 0x4e0   :  { %v228_v6 = vpop.f32.mrf.mxu2 }
 0x4e1   :  { %v867_v7 = vpack.i.bf16 %v228_v6, %v226_v4 }
 0x4e2   :  { %v295_v8 = vpop.f32.mrf.mxu1 }
 0x4e3   :  { %868 = vrot.lane.b32.xlu2 %v867_v7, %s1000_s25  ;;  %v872_v10 = vpack.i.bf16 %v295_v8, %v293_v5 }
 0x4e8   :  { %v360_v9 = vpop.f32.mrf.mxu2 }
 0x4eb   :  { %873 = vrot.lane.b32.xlu2 %v872_v10, %s1001_s26 }
 0x4f0   :  { %v362_v11 = vpop.f32.mrf.mxu2 }
 0x4f1   :  { %v877_v12 = vpack.i.bf16 %v362_v11, %v360_v9 }
 0x4f3   :  { %878 = vrot.lane.b32.xlu0 %v877_v12, %s1002_s27  ;;  %s753_s27 = sshll.u32 %s1240_s7, 4  ;;  %s754_s27 = int_to_ptr.hbm [resolvable:$true] %s753_s27 }
 0x53d   :  { %v869_v16 = vpop.permute.xlu2 %868 }
 0x53e   :  { %v871_v18 = vunpack.i.h.bf16 %v869_v16  ;;  %v870_v19 = vunpack.i.l.bf16 %v869_v16 }
 0x540   :  { %v390_v23 = vsel %vm99_vm1, %v1106_v53, %v871_v18  ;;  %v389_v24 = vsel %vm99_vm1, %v1104_v52, %v870_v19  ;;  %v885_v18 = vld [vmem:[#allocation2 + $0x3] ss:$0 sm:$0xff] }
 0x545   :  { %v874_v17 = vpop.permute.xlu2 %873 }
 0x546   :  { %v876_v20 = vunpack.i.h.bf16 %v874_v17  ;;  %v875_v21 = vunpack.i.l.bf16 %v874_v17 }
 0x548   :  { %v392_v27 = vsel %vm120_vm2, %v390_v23, %v876_v20  ;;  %v391_v28 = vsel %vm120_vm2, %v389_v24, %v875_v21 }
 0x565   :  { %v879_v22 = vpop.permute.xlu0 %878 }
 0x566   :  { %v881_v25 = vunpack.i.h.bf16 %v879_v22  ;;  %v880_v26 = vunpack.i.l.bf16 %v879_v22 }
 0x568   :  { %v394_v29 = vsel %vm393_vm3, %v391_v28, %v880_v26  ;;  %v395_v30 = vsel %vm393_vm3, %v392_v27, %v881_v25  ;;  %v886_v25 = vld [vmem:[#allocation2 + $0x4] ss:$0 sm:$0xff]  ;;  %v848_v28 = vld [vmem:[%s1237_s4 + $0x38] sm:$0xff] }
 0x569   :  { %v396_v31 = vpack.c.bf16 %v395_v30, %v394_v29  ;;  %679 = vmatpush.bf16.msrb.mxu3 %v848_v28 }
 0x56b   :  { %791 = vmatmul.msk.bf16.vlgmr.msra.gmra.mxu0 %vm70_vm0, %v396_v31  ;;  %v847_v31 = vld [vmem:[%s1237_s4 + $0x30] sm:$0xff] }
 0x56d   :  { %680 = vmatpush.bf16.msrb.mxu3 %v847_v31 }
 0x5e8   :  { %v426_v33 = vpop.f32.mrf.mxu0 }
 0x5e9   :  { %v427_v34 = vadd.f32 %v883_v32, %v426_v33 }
 0x5eb   :  { %v431_v35 = vadd.f32 %v427_v34, %v1058_v2 }
 0x5ed   :  { %v433_v53 = vsel %vm70_vm0, %v431_v35, 0.0 }
 0x5ee   :  { %434 = vadd.xlane.f32.xlu2 %v433_v53 }
 0x5f0   :  { %v428_v52 = vpop.f32.mrf.mxu0 }
 0x5f1   :  { %v429_v36 = vadd.f32 %v883_v32, %v428_v52  ;;  %v846_v52 = vld [vmem:[%s1237_s4 + $0x28] sm:$0xff] }
 0x5f2   :  { %681 = vmatpush.bf16.msrb.mxu3 %v846_v52 }
 0x5f3   :  { %v432_v37 = vadd.f32 %v429_v36, %v1063_v3 }
 0x5f5   :  { %v436_v38 = vsel %vm70_vm0, %v432_v37, 0.0 }
 0x5f6   :  { %437 = vadd.xlane.f32.xlu1 %v436_v38  ;;  %682 = vmatpush.bf16.msrb.mxu3 %v845_v40 }
 0x661   :  { %v435_v2 = vpop.xlane.xlu2 %434 }
 0x662   :  { %v446_v46 = vmul.f32 %v1154_v45, %v435_v2 }
 0x664   :  { %v448_v47 = vsub.f32 %v431_v35, %v446_v46  ;;  %v844_v46 = vld [vmem:[%s1237_s4 + $0x18] sm:$0xff] }
 0x665   :  { %683 = vmatpush.bf16.msrb.mxu3 %v844_v46 }
 0x666   :  { %v450_v48 = vmul.f32 %v448_v47, %v448_v47 }
 0x668   :  { %v452_v3 = vsel %vm70_vm0, %v450_v48, 0.0 }
 0x669   :  { %v438_v49 = vpop.xlane.xlu1 %437  ;;  %453 = vadd.xlane.f32.xlu0 %v452_v3 }
 0x66a   :  { %v447_v50 = vmul.f32 %v1154_v45, %v438_v49 }
 0x66c   :  { %v449_v51 = vsub.f32 %v432_v37, %v447_v50 }
 0x66e   :  { %v451_v54 = vmul.f32 %v449_v51, %v449_v51 }
 0x670   :  { %v455_v55 = vsel %vm70_vm0, %v451_v54, 0.0 }
 0x671   :  { %456 = vadd.xlane.f32.xlu2 %v455_v55  ;;  %v843_v55 = vld [vmem:[%s1237_s4 + $0x10] sm:$0xff] }
 0x672   :  { %684 = vmatpush.bf16.msrb.mxu3 %v843_v55 }
 0x6dc   :  { %v454_v14 = vpop.xlane.xlu0 %453 }
 0x6dd   :  { %v458_v57 = vmul.f32 %v454_v14, %v1154_v45 }
 0x6df   :  { %v460_v58 = vadd.f32 1e-05, %v458_v57 }
 0x6e1   :  { %924 = vrsqrt.f32 %v460_v58  ;;  %vm468_vm6 = vweird.f32 %v460_v58 }
 0x6e4   :  { %v457_v60 = vpop.xlane.xlu2 %456 }
 0x6e5   :  { %v459_v61 = vmul.f32 %v457_v60, %v1154_v45 }
 0x6e7   :  { %v925_v62 = vpop.eup %924  ;;  %v461_v63 = vadd.f32 1e-05, %v459_v61 }
 0x6e8   :  { %v463_v0 = vmul.f32 %v925_v62, %v460_v58  ;;  %vm469_vm5 = vweird.f32 %v925_v62 }
 0x6e9   :  { %926 = vrsqrt.f32 %v461_v63  ;;  %vm470_vm7 = vmor %vm468_vm6, %vm469_vm5  ;;  %vm478_vm9 = vweird.f32 %v461_v63 }
 0x6ea   :  { %v464_v1 = vmul.f32 %v925_v62, %v463_v0 }
 0x6ec   :  { %v465_v4 = vmul.f32 0.5, %v464_v1 }
 0x6ee   :  { %v466_v5 = vsub.f32 1.5, %v465_v4 }
 0x6ef   :  { %v927_v6 = vpop.eup %926 }
 0x6f0   :  { %v467_v7 = vmul.f32 %v925_v62, %v466_v5  ;;  %v473_v8 = vmul.f32 %v927_v6, %v461_v63  ;;  %vm479_vm8 = vweird.f32 %v927_v6 }
 0x6f1   :  { %vm480_vm10 = vmor %vm478_vm9, %vm479_vm8 }
 0x6f2   :  { %v474_v9 = vmul.f32 %v927_v6, %v473_v8  ;;  %v471_v10 = vsel %vm470_vm7, %v925_v62, %v467_v7  ;;  %v842_v62 = vld [vmem:[%s1237_s4 + $0x8] sm:$0xff] }
 0x6f3   :  { %v482_v15 = vmul.f32 %v471_v10, %v448_v47  ;;  %685 = vmatpush.bf16.msrb.mxu3 %v842_v62 }
 0x6f4   :  { %v475_v11 = vmul.f32 0.5, %v474_v9 }
 0x6f5   :  { %v485_v19 = vmul.f32 %v884_v13, %v482_v15 }
 0x6f6   :  { %v476_v12 = vsub.f32 1.5, %v475_v11 }
 0x6f7   :  { %v1168_v22 = vadd.f32 %v885_v18, %v485_v19 }
 0x6f8   :  { %v477_v16 = vmul.f32 %v927_v6, %v476_v12 }
 0x6fa   :  { %v481_v17 = vsel %vm480_vm10, %v927_v6, %v477_v16  ;;  %v841_v6 = vld [vmem:[%s1237_s4] sm:$0xff]  ;;  %s1004_s4 = smov [#allocation5]  }
 0x6fb   :  { %v483_v20 = vmul.f32 %v481_v17, %v449_v51  ;;  %686 = vmatpush.bf16.msrb.mxu3 %v841_v6  ;;  %s751_s23 = sshll.u32 %s1004_s4, 4  ;;  %s752_s23 = int_to_ptr.vmem [resolvable:$true] %s751_s23 }
 0x6fd   :  { %v486_v21 = vmul.f32 %v884_v13, %v483_v20 }
 0x6ff   :  { %v1170_v23 = vadd.f32 %v885_v18, %v486_v21 }
 0x701   :  { %v490_v24 = vpack.c.bf16 %v1170_v23, %v1168_v22 }
 0x703   :  { %800 = vmatmul.msk.bf16.vlgmr.msra.gmra.mxu1 %vm70_vm0, %v490_v24 }
 0x780   :  { %v520_v26 = vpop.f32.mrf.mxu1 }
 0x781   :  { %v1175_v27 = vadd.f32 %v886_v25, %v520_v26 }
 0x783   :  { %v1181_v29 = vmul.f32 0.70710677, %v1175_v27 }
 0x785   :  { %v529_v30 = vmul.f32 %v1181_v29, %v1181_v29 }
 0x787   :  { %v530_v32 = vmin.f32 %v529_v30, 16.0 }
 0x788   :  { %v522_v33 = vpop.f32.mrf.mxu1 }
 0x789   :  { %v531_v34 = vmul.f32 2.1237322e-06, %v530_v32  ;;  %v542_v35 = vmul.f32 3.8918573e-05, %v530_v32  ;;  %v1188_v53 = vadd.f32 %v886_v25, %v522_v33 }
 0x78b   :  { %v532_v36 = vadd.f32 0.00028619796, %v531_v34  ;;  %v543_v37 = vadd.f32 0.001143296, %v542_v35  ;;  %v1194_v38 = vmul.f32 0.70710677, %v1188_v53 }
 0x78d   :  { %v544_v39 = vmul.f32 %v543_v37, %v530_v32  ;;  %v569_v41 = vmul.f32 %v1194_v38, %v1194_v38  ;;  %v533_v42 = vmul.f32 %v532_v36, %v530_v32 }
 0x78f   :  { %v545_v43 = vadd.f32 0.014752088, %v544_v39  ;;  %v570_v44 = vmin.f32 %v569_v41, 16.0  ;;  %v534_v3 = vadd.f32 0.0036580483, %v533_v42 }
 0x791   :  { %v546_v2 = vmul.f32 %v545_v43, %v530_v32  ;;  %v571_v47 = vmul.f32 2.1237322e-06, %v570_v44  ;;  %v582_v48 = vmul.f32 3.8918573e-05, %v570_v44  ;;  %v535_v57 = vmul.f32 %v534_v3, %v530_v32 }
 0x793   :  { %v547_v49 = vadd.f32 0.112945676, %v546_v2  ;;  %v572_v50 = vadd.f32 0.00028619796, %v571_v47  ;;  %v583_v51 = vadd.f32 0.001143296, %v582_v48 }
 0x794   :  { %v536_v0 = vadd.f32 0.05243302, %v535_v57  ;;  %v887_v57 = vld [vmem:[#allocation2 + $0x5] ss:$0 sm:$0xff] }
 0x795   :  { %v548_v54 = vmul.f32 %v547_v49, %v530_v32  ;;  %v573_v56 = vmul.f32 %v572_v50, %v570_v44  ;;  %v584_v14 = vmul.f32 %v583_v51, %v570_v44  ;;  %v525_v50 = vmul.f32 0.5, %v1175_v27 }
 0x796   :  { %v537_v8 = vmul.f32 %v536_v0, %v530_v32  ;;  %v526_v51 = vmul.f32 0.5, %v1188_v53 }
 0x797   :  { %v549_v58 = vadd.f32 0.4994258, %v548_v54  ;;  %v574_v59 = vadd.f32 0.0036580483, %v573_v56  ;;  %v585_v60 = vadd.f32 0.014752088, %v584_v14 }
 0x798   :  { %v538_v13 = vadd.f32 0.18741608, %v537_v8 }
 0x799   :  { %v550_v61 = vmul.f32 %v549_v58, %v530_v32  ;;  %v586_v63 = vmul.f32 %v585_v60, %v570_v44  ;;  %v575_v4 = vmul.f32 %v574_v59, %v570_v44 }
 0x79a   :  { %v539_v19 = vmul.f32 %v538_v13, %v530_v32 }
 0x79b   :  { %v551_v1 = vadd.f32 1.0, %v550_v61  ;;  %v587_v5 = vadd.f32 0.112945676, %v586_v63  ;;  %v576_v9 = vadd.f32 0.05243302, %v575_v4 }
 0x79c   :  { %v540_v28 = vadd.f32 1.1283791, %v539_v19 }
 0x79d   :  { %928 = vrcp.f32 %v551_v1  ;;  %v588_v7 = vmul.f32 %v587_v5, %v570_v44  ;;  %v577_v16 = vmul.f32 %v576_v9, %v570_v44  ;;  %v563_v21 = vand.u32 2147483648, %v551_v1 }
 0x79e   :  { %v561_v25 = vand.u32 2147483647, %v551_v1  ;;  %vm557_vm12 = vweird.f32 %v551_v1  ;;  %v541_v36 = vmul.f32 %v540_v28, %v1181_v29 }
 0x79f   :  { %v589_v10 = vadd.f32 0.4994258, %v588_v7  ;;  %v578_v24 = vadd.f32 0.18741608, %v577_v16  ;;  %v564_v33 = vor.u32 1.1754944e-38, %v563_v21 }
 0x7a0   :  { %vm562_vm14 = vcmp.eq.f32.partialorder %v561_v25, 8.507059e+37 }
 0x7a1   :  { %v590_v11 = vmul.f32 %v589_v10, %v570_v44  ;;  %v579_v34 = vmul.f32 %v578_v24, %v570_v44 }
 0x7a3   :  { %v929_v12 = vpop.eup %928  ;;  %v591_v17 = vadd.f32 1.0, %v590_v11  ;;  %v580_v32 = vadd.f32 1.1283791, %v579_v34 }
 0x7a4   :  { %v553_v15 = vmul.f32 %v929_v12, %v551_v1  ;;  %vm558_vm11 = vweird.f32 %v929_v12 }
 0x7a5   :  { %930 = vrcp.f32 %v591_v17  ;;  %vm559_vm13 = vmor %vm557_vm12, %vm558_vm11  ;;  %v603_v39 = vand.u32 2147483648, %v591_v17  ;;  %v601_v42 = vand.u32 2147483647, %v591_v17  ;;  %vm597_vm1 = vweird.f32 %v591_v17 }
 0x7a6   :  { %v554_v18 = vsub.f32 1.0, %v553_v15  ;;  %v581_v47 = vmul.f32 %v580_v32, %v1194_v38 }
 0x7a7   :  { %v604_v2 = vor.u32 1.1754944e-38, %v603_v39  ;;  %vm602_vm3 = vcmp.eq.f32.partialorder %v601_v42, 8.507059e+37 }
 0x7a8   :  { %v555_v20 = vmul.f32 %v929_v12, %v554_v18 }
 0x7aa   :  { %v556_v26 = vadd.f32 %v929_v12, %v555_v20 }
 0x7ab   :  { %v931_v30 = vpop.eup %930 }
 0x7ac   :  { %v560_v31 = vsel %vm559_vm13, %v929_v12, %v556_v26  ;;  %v593_v35 = vmul.f32 %v931_v30, %v591_v17  ;;  %vm598_vm15 = vweird.f32 %v931_v30  ;;  %v888_v26 = vld [vmem:[#allocation2 + $0x6] ss:$0 sm:$0xff] }
 0x7ad   :  { %v565_v52 = vsel %vm562_vm14, %v564_v33, %v560_v31  ;;  %vm599_vm2 = vmor %vm597_vm1, %vm598_vm15  ;;  %v889_v31 = vld [vmem:[#allocation2 + $0x7] ss:$0 sm:$0xff] }
 0x7ae   :  { %v594_v37 = vsub.f32 1.0, %v593_v35  ;;  %v566_v40 = vmul.f32 %v565_v52, %v541_v36 }
 0x7b0   :  { %v595_v41 = vmul.f32 %v931_v30, %v594_v37  ;;  %v801_v46 = vclamps-f32 %v566_v40, 1.0 }
 0x7b2   :  { %v596_v43 = vadd.f32 %v931_v30, %v595_v41  ;;  %v609_v49 = vadd.f32 1.0, %v801_v46 }
 0x7b4   :  { %v600_v44 = vsel %vm599_vm2, %v931_v30, %v596_v43  ;;  %v611_v55 = vmul.f32 %v609_v49, %v525_v50 }
 0x7b5   :  { %v605_v48 = vsel %vm602_vm3, %v604_v2, %v600_v44 }
 0x7b6   :  { %v606_v3 = vmul.f32 %v605_v48, %v581_v47 }
 0x7b8   :  { %v802_v29 = vclamps-f32 %v606_v3, 1.0 }
 0x7ba   :  { %v610_v54 = vadd.f32 1.0, %v802_v29 }
 0x7bc   :  { %v612_v56 = vmul.f32 %v610_v54, %v526_v51 }
 0x7be   :  { %v613_v14 = vpack.c.bf16 %v612_v56, %v611_v55 }
 0x7c0   :  { %687 = vmatmul.bf16.vlgmr.msrb.gmra.mxu3 %v613_v14 }
 0x843   :  { %v688_v58 = vpop.f32.mrf.mxu3 }
 0x844   :  { %v689_v59 = vadd.f32 %v887_v57, %v688_v58 }
 0x846   :  { %v693_v38 = vadd.f32 %v689_v59, %v1168_v22 }
 0x848   :  { %v695_v60 = vsel %vm70_vm0, %v693_v38, 0.0 }
 0x849   :  { %696 = vadd.xlane.f32.xlu1 %v695_v60 }
 0x84b   :  { %v690_v61 = vpop.f32.mrf.mxu3 }
 0x84c   :  { %v691_v62 = vadd.f32 %v887_v57, %v690_v61 }
 0x84e   :  { %v694_v63 = vadd.f32 %v691_v62, %v1170_v23 }
 0x850   :  { %v698_v27 = vsel %vm70_vm0, %v694_v63, 0.0 }
 0x851   :  { %699 = vadd.xlane.f32.xlu0 %v698_v27 }
 0x8bc   :  { %v697_v53 = vpop.xlane.xlu1 %696 }
 0x8bd   :  { %v701_v0 = vmul.f32 %v697_v53, %v1154_v45 }
 0x8bf   :  { %v703_v1 = vsub.f32 %v693_v38, %v701_v0 }
 0x8c1   :  { %v705_v4 = vmul.f32 %v703_v1, %v703_v1 }
 0x8c3   :  { %v707_v5 = vsel %vm70_vm0, %v705_v4, 0.0 }
 0x8c4   :  { %v700_v6 = vpop.xlane.xlu0 %699  ;;  %708 = vadd.xlane.f32.xlu2 %v707_v5 }
 0x8c5   :  { %v702_v22 = vmul.f32 %v700_v6, %v1154_v45 }
 0x8c7   :  { %v704_v7 = vsub.f32 %v694_v63, %v702_v22 }
 0x8c9   :  { %v706_v8 = vmul.f32 %v704_v7, %v704_v7 }
 0x8cb   :  { %v710_v9 = vsel %vm70_vm0, %v706_v8, 0.0 }
 0x8cc   :  { %711 = vadd.xlane.f32.xlu1 %v710_v9 }
 0x937   :  { %v709_v23 = vpop.xlane.xlu2 %708 }
 0x938   :  { %v713_v10 = vmul.f32 %v709_v23, %v1154_v45 }
 0x93a   :  { %v715_v11 = vadd.f32 1e-05, %v713_v10 }
 0x93c   :  { %932 = vrsqrt.f32 %v715_v11  ;;  %vm723_vm5 = vweird.f32 %v715_v11 }
 0x93f   :  { %v712_v12 = vpop.xlane.xlu1 %711 }
 0x940   :  { %v714_v13 = vmul.f32 %v712_v12, %v1154_v45 }
 0x942   :  { %v933_v15 = vpop.eup %932  ;;  %v716_v16 = vadd.f32 1e-05, %v714_v13 }
 0x943   :  { %v718_v17 = vmul.f32 %v933_v15, %v715_v11  ;;  %vm724_vm4 = vweird.f32 %v933_v15 }
 0x944   :  { %934 = vrsqrt.f32 %v716_v16  ;;  %vm725_vm6 = vmor %vm723_vm5, %vm724_vm4  ;;  %vm733_vm8 = vweird.f32 %v716_v16 }
 0x945   :  { %v719_v18 = vmul.f32 %v933_v15, %v718_v17 }
 0x947   :  { %v720_v19 = vmul.f32 0.5, %v719_v18 }
 0x949   :  { %v721_v20 = vsub.f32 1.5, %v720_v19 }
 0x94a   :  { %v935_v21 = vpop.eup %934 }
 0x94b   :  { %v722_v24 = vmul.f32 %v933_v15, %v721_v20  ;;  %v728_v25 = vmul.f32 %v935_v21, %v716_v16  ;;  %vm734_vm7 = vweird.f32 %v935_v21 }
 0x94c   :  { %vm735_vm9 = vmor %vm733_vm8, %vm734_vm7 }
 0x94d   :  { %v726_v28 = vsel %vm725_vm6, %v933_v15, %v722_v24  ;;  %v729_v30 = vmul.f32 %v935_v21, %v728_v25 }
 0x94e   :  { %v737_v33 = vmul.f32 %v726_v28, %v703_v1 }
 0x94f   :  { %v730_v34 = vmul.f32 0.5, %v729_v30 }
 0x950   :  { %v740_v45 = vmul.f32 %v888_v26, %v737_v33 }
 0x951   :  { %v731_v35 = vsub.f32 1.5, %v730_v34 }
 0x952   :  { %v743_v52 = vadd.f32 %v889_v31, %v740_v45 }
 0x953   :  { %v732_v36 = vmul.f32 %v935_v21, %v731_v35 }
 0x954   :  { %745 = vst.msk [vmem:[#allocation5] sm:$0xff] %vm70_vm0, %v743_v52 }
 0x955   :  { %v736_v37 = vsel %vm735_vm9, %v935_v21, %v732_v36 }
 0x956   :  { %v738_v32 = vmul.f32 %v736_v37, %v704_v7 }
 0x958   :  { %v741_v39 = vmul.f32 %v888_v26, %v738_v32 }
 0x95a   :  { %v744_v40 = vadd.f32 %v889_v31, %v741_v39 }
 0x95c   :  { %746 = vst.msk [vmem:[#allocation5 + $0x8] sm:$0xff] %vm70_vm0, %v744_v40 }
 0x95d   :  { %759 = dma.vmem_to_hbm [thread:$0]  %s752_s23, 256, %s754_s27, [#allocation4], %s1005_s28, %s1005_s28, %s1000_s25  }
 0x95e   :  { %986 = dma.done.wait [#allocation4], 256  }
 0x95f   :  { %987 = vsyncadd [#allocation4], 4294967040 }
 0x960   :  { %764 = vsyncpa [#allocation3], 1 }
 0x961   :  { %765 = vsyncpa [#allocation4], 1 }

</bundles_post_ra>
